<compile_context>
chip_gen: v6e
topology: v6e:2x2x1
jax: 0.10.0
libtpu: 0.0.40
codegen_flags: <defaults>
</compile_context>

<pallas_src>
import math

import jax
import jax.numpy as jnp
from jax.experimental import pallas as pl
from jax.experimental.pallas import tpu as pltpu


def _eltwise_add_kernel(*refs):
    # refs = (in_ref_0, ..., in_ref_{k-1}, out_ref); pure VPU element-wise sum.
    in_refs, out_ref = refs[:-1], refs[-1]
    acc = in_refs[0][...]
    for r in in_refs[1:]:
        acc = acc + r[...]
    out_ref[...] = acc


def _round_up(x, m):
    return (x + m - 1) // m * m


# Conservative double-buffered VMEM budget (bytes): fits v5e's 16 MiB scoped
# default and leaves plenty of headroom on v7x's 64 MiB physical VMEM.
_VMEM_BUDGET = 12 * 1024 * 1024
_SUBLANE_MULT = 32  # safe sublane multiple for every dtype (f32/bf16/int8)


def _choose_layout(n_elems, n_operands, itemsize):
    """Pick (lanes, row_tile, padded_rows) for a lane-dense 2D view."""
    lanes = 128
    for cand in (1024, 512, 256):
        if n_elems >= cand * 64:  # enough rows that lane padding is negligible
            lanes = cand
            break
    rows = pl.cdiv(n_elems, lanes)
    bytes_per_row = lanes * itemsize
    # Shrink the tile when many operands are summed so that the double-buffered
    # working set 2 * n_operands * tile_bytes stays inside the budget.
    max_tm = max(
        _SUBLANE_MULT,
        (_VMEM_BUDGET // (2 * n_operands * bytes_per_row))
        // _SUBLANE_MULT * _SUBLANE_MULT,
    )
    tm = min(512, max_tm, _round_up(rows, _SUBLANE_MULT))
    rows_padded = _round_up(rows, tm)
    return lanes, tm, rows_padded


def eltwise_add(*inputs, inplace=False):
    """Element-wise sum of any number of same-shape/dtype tensors."""
    assert len(inputs) >= 1
    x0 = inputs[0]
    shape, dtype = x0.shape, x0.dtype
    for t in inputs[1:]:
        assert t.shape == shape and t.dtype == dtype, \
            "all inputs must have identical shape/dtype (no broadcasting here)"

    if len(inputs) == 1:
        return x0

    n_elems = math.prod(shape) if shape else 1
    if n_elems == 0:
        return x0

    itemsize = jnp.dtype(dtype).itemsize
    lanes, tm, rows_padded = _choose_layout(n_elems, len(inputs) + 1, itemsize)
    pad = rows_padded * lanes - n_elems

    def _prep(t):
        flat = t.reshape(-1)
        if pad:
            flat = jnp.pad(flat, (0, pad))
        return flat.reshape(rows_padded, lanes)

    flat_inputs = [_prep(t) for t in inputs]

    grid = (rows_padded // tm,)
    spec = pl.BlockSpec((tm, lanes), lambda i: (i, 0))

    # inplace: write the sum back into the first input's buffer (which is a
    # fresh padded temporary, so donation cannot clobber the caller's array).
    aliases = {0: 0} if (inplace and pad > 0) else {}

    out = pl.pallas_call(
        _eltwise_add_kernel,
        out_shape=jax.ShapeDtypeStruct((rows_padded, lanes), dtype),
        grid=grid,
        in_specs=[spec] * len(flat_inputs),
        out_specs=spec,
        input_output_aliases=aliases,
        compiler_params=pltpu.CompilerParams(
            dimension_semantics=("parallel",),
            vmem_limit_bytes=32 * 1024 * 1024,
        ),
    )(*flat_inputs)

    return out.reshape(-1)[:n_elems].reshape(shape)


class EltwiseAdd:
    """Mirror of the PyTorch module.

    `inplace=True` has no observable mutation semantics under JAX's functional
    arrays; it is honored as output/input buffer aliasing inside the kernel
    call, and the numerical result is identical to the out-of-place path.
    """

    def __init__(self, inplace=False):
        self.inplace = inplace  # TODO(synk): true in-place mutation of the caller's tensor has no JAX equivalent.

    def __call__(self, *inputs):
        return eltwise_add(*inputs, inplace=self.inplace)


if __name__ == "__main__":
    key = jax.random.PRNGKey(0)

    # Small NCHW case (matches the module's typical use).
    k1, k2, k3 = jax.random.split(key, 3)
    shape = (2, 4, 16, 16)
    a = jax.random.normal(k1, shape, dtype=jnp.float32)
    b = jax.random.normal(k2, shape, dtype=jnp.float32)
    c = jax.random.normal(k3, shape, dtype=jnp.float32)

    ref = a + b + c

    out = EltwiseAdd(inplace=False)(a, b, c)
    out = jax.block_until_ready(out)
    assert out.shape == shape and out.dtype == jnp.float32
    assert jnp.allclose(out, ref, atol=1e-6, rtol=1e-6)

    # Inplace path (exercises input_output_aliases on the padded first input).
    out_ip = EltwiseAdd(inplace=True)(a, b, c)
    out_ip = jax.block_until_ready(out_ip)
    assert jnp.allclose(out_ip, ref, atol=1e-6, rtol=1e-6)

    # Larger case that exercises the lane-dense tiled (grid > 1) path.
    k4, k5, k6 = jax.random.split(jax.random.PRNGKey(1), 3)
    shape2 = (8, 8, 128, 128)
    x = jax.random.normal(k4, shape2, dtype=jnp.float32)
    y = jax.random.normal(k5, shape2, dtype=jnp.float32)
    z = jax.random.normal(k6, shape2, dtype=jnp.float32)
    out2 = EltwiseAdd()(x, y, z)
    out2 = jax.block_until_ready(out2)
    assert jnp.allclose(out2, x + y + z, atol=1e-5, rtol=1e-5)

    print("KERNEL_OK")
</pallas_src>

<mosaic_0001>
module attributes {stable_mosaic.version = 11 : i64} {
  func.func @_eltwise_add_kernel(%arg0: i32, %arg1: memref<32x128xf32, #tpu.memory_space<vmem>>, %arg2: memref<32x128xf32, #tpu.memory_space<vmem>>, %arg3: memref<32x128xf32, #tpu.memory_space<vmem>>, %arg4: memref<32x128xf32, #tpu.memory_space<vmem>>) attributes {dimension_semantics = [#tpu.dimension_semantics<parallel>], iteration_bounds = array<i64: 1>, scalar_prefetch = 0 : i64, scratch_operands = 0 : i64, tpu.core_type = #tpu.core_type<tc>, window_params = [{transform_indices = @transform_0, window_bounds = array<i64: 32, 128>}, {transform_indices = @transform_1, window_bounds = array<i64: 32, 128>}, {transform_indices = @transform_2, window_bounds = array<i64: 32, 128>}, {transform_indices = @transform_3, window_bounds = array<i64: 32, 128>}]} {
    %c0 = arith.constant 0 : index
    %c0_0 = arith.constant 0 : index
    %0 = vector.load %arg1[%c0, %c0_0] : memref<32x128xf32, #tpu.memory_space<vmem>>, vector<32x128xf32>
    %c0_1 = arith.constant 0 : index
    %c0_2 = arith.constant 0 : index
    %1 = vector.load %arg2[%c0_1, %c0_2] : memref<32x128xf32, #tpu.memory_space<vmem>>, vector<32x128xf32>
    %2 = arith.addf %0, %1 : vector<32x128xf32>
    %c0_3 = arith.constant 0 : index
    %c0_4 = arith.constant 0 : index
    %3 = vector.load %arg3[%c0_3, %c0_4] : memref<32x128xf32, #tpu.memory_space<vmem>>, vector<32x128xf32>
    %4 = arith.addf %2, %3 : vector<32x128xf32>
    %c0_5 = arith.constant 0 : index
    %c0_6 = arith.constant 0 : index
    %5 = vector.load %arg4[%c0_5, %c0_6] : memref<32x128xf32, #tpu.memory_space<vmem>>, vector<32x128xf32>
    tpu.vector_store %arg4[%c0_5, %c0_6], %4 {strides = array<i32>} : memref<32x128xf32, #tpu.memory_space<vmem>>, vector<32x128xf32>,
    return
  }
  func.func @transform_0(%arg0: i32) -> (i32, i32) {
    %c0_i32 = arith.constant 0 : i32
    %c0_i32_0 = arith.constant 0 : i32
    return %arg0, %c0_i32 : i32, i32
  }
  func.func @transform_1(%arg0: i32) -> (i32, i32) {
    %c0_i32 = arith.constant 0 : i32
    %c0_i32_0 = arith.constant 0 : i32
    return %arg0, %c0_i32 : i32, i32
  }
  func.func @transform_2(%arg0: i32) -> (i32, i32) {
    %c0_i32 = arith.constant 0 : i32
    %c0_i32_0 = arith.constant 0 : i32
    return %arg0, %c0_i32 : i32, i32
  }
  func.func @transform_3(%arg0: i32) -> (i32, i32) {
    %c0_i32 = arith.constant 0 : i32
    %c0_i32_0 = arith.constant 0 : i32
    return %arg0, %c0_i32 : i32, i32
  }
}

</mosaic_0001>

<bundles_post_ra>
// kernel: tpu_custom_call.1
= control target key start
LH: loop header
LB: loop body
LE: loop exit
PB: predicated region body
PF: predicated region fallthrough
CT: control target
= control target key end

     0   :  { %8 = vsyncpa [#allocation3], 0  ;;  %s240_s0 = inlined_call_operand.hbm [shape: f32[32,128], index: 0, kind: input, shape index: {}]   ;;  %s241_s1 = inlined_call_operand.hbm [shape: f32[32,128], index: 1, kind: input, shape index: {}]   ;;  %s242_s2 = inlined_call_operand.hbm [shape: f32[32,128], index: 2, kind: input, shape index: {}]   ;;  %s243_s3 = inlined_call_operand.hbm [shape: f32[32,128], index: 3, kind: output, shape index: {}]  }
   0x1   :  { %9 = vsyncpa [#allocation6], 0 }
   0x2   :  { %10 = vsyncpa [#allocation4], 0  ;;  %s190_s12 = smov [#allocation5]   ;;  %s191_s14 = smov [#allocation2]  }
   0x3   :  { %s28_s13 = sshll.u32 %s190_s12, 4  ;;  %s16_s15 = sshll.u32 %s191_s14, 4  ;;  %s29_s13 = int_to_ptr.vmem [resolvable:$true] %s28_s13  ;;  %s17_s15 = int_to_ptr.vmem [resolvable:$true] %s16_s15 }
   0x4   :  { %s112_s16 = scalar_lea.vmem %s29_s13, 512  ;;  %p117_p1 = scmp.lt.s32.totalorder %s29_s13, %s29_s13 }
   0x5   :  { %p113_p0 = scmp.ne.s32.totalorder %s29_s13, %s112_s16  ;;  %p118_p2 = scmp.lt.s32.totalorder %s112_s16, %s112_s16 }
   0x7   :  { %p119_p3 = por %p118_p2, %p117_p1 }
   0x9   :  { %p120_p4 = pnand %p119_p3, %p113_p0 }
   0xb   :  { %123 = shalt.err (!%p120_p4)
}
   0xc   :  { %s192_s17 = smov 128   ;;  %s193_s18 = smov 8  }
   0xd   :  { %34 = dma.hbm_to_vmem [thread:$0]  %s241_s1, 512, %s29_s13, [#allocation6], %s192_s17, %s192_s17, %s193_s18  }
   0xe   :  { %s132_s21 = scalar_lea.vmem %s17_s15, 512  ;;  %p137_p6 = scmp.lt.s32.totalorder %s17_s15, %s17_s15 }
   0xf   :  { %p133_p5 = scmp.ne.s32.totalorder %s17_s15, %s132_s21  ;;  %p138_p7 = scmp.lt.s32.totalorder %s132_s21, %s132_s21 }
  0x11   :  { %p139_p8 = por %p138_p7, %p137_p6 }
  0x13   :  { %p140_p9 = pnand %p139_p8, %p133_p5 }
  0x15   :  { %143 = shalt.err (!%p140_p9)
}
  0x16   :  { %22 = dma.hbm_to_vmem [thread:$0]  %s240_s0, 512, %s17_s15, [#allocation3], %s192_s17, %s192_s17, %s193_s18  }
  0x17   :  { %s194_s24 = smov [#allocation7]  }
  0x18   :  { %s40_s25 = sshll.u32 %s194_s24, 4  ;;  %s41_s25 = int_to_ptr.vmem [resolvable:$true] %s40_s25 }
  0x19   :  { %s152_s26 = scalar_lea.vmem %s41_s25, 512  ;;  %p157_p11 = scmp.lt.s32.totalorder %s41_s25, %s41_s25 }
  0x1a   :  { %p153_p10 = scmp.ne.s32.totalorder %s41_s25, %s152_s26  ;;  %p158_p12 = scmp.lt.s32.totalorder %s152_s26, %s152_s26 }
  0x1c   :  { %p159_p13 = por %p158_p12, %p157_p11 }
  0x1e   :  { %p160_p0 = pnand %p159_p13, %p153_p10 }
  0x20   :  { %163 = shalt.err (!%p160_p0)
}
  0x21   :  { %46 = dma.hbm_to_vmem [thread:$0]  %s242_s2, 512, %s41_s25, [#allocation6], %s192_s17, %s192_s17, %s193_s18  }
  0x22   :  { %184 = dma.done.wait [#allocation3], 512  }
  0x23   :  { %185 = vsyncadd [#allocation3], 4294966784 }
  0x24   :  { %186 = dma.done.wait [#allocation6], 1024  }
  0x25   :  { %187 = vsyncadd [#allocation6], 4294966272  ;;  %v56_v0 = vld [vmem:[#allocation2] sm:$0xff]  ;;  %v57_v4 = vld [vmem:[#allocation2 + $0x8] sm:$0xff]  ;;  %s195_s0 = smov [#allocation8]  }
  0x26   :  { %v60_v1 = vld [vmem:[#allocation5] sm:$0xff]  ;;  %v61_v5 = vld [vmem:[#allocation5 + $0x8] sm:$0xff]  ;;  %v58_v8 = vld [vmem:[#allocation2 + $0x10] sm:$0xff]  ;;  %s85_s2 = sshll.u32 %s195_s0, 4  ;;  %s86_s2 = int_to_ptr.vmem [resolvable:$true] %s85_s2 }
  0x27   :  { %v68_v2 = vld [vmem:[#allocation7] sm:$0xff]  ;;  %v64_v3 = vadd.f32 %v60_v1, %v56_v0  ;;  %v69_v6 = vld [vmem:[#allocation7 + $0x8] sm:$0xff]  ;;  %v65_v7 = vadd.f32 %v61_v5, %v57_v4  ;;  %v62_v9 = vld [vmem:[#allocation5 + $0x10] sm:$0xff]  ;;  %s164_s28 = scalar_lea.vmem %s86_s2, 512  ;;  %p169_p2 = scmp.lt.s32.totalorder %s86_s2, %s86_s2 }
  0x28   :  { %v70_v10 = vld [vmem:[#allocation7 + $0x10] sm:$0xff]  ;;  %v66_v12 = vadd.f32 %v62_v9, %v58_v8  ;;  %v59_v13 = vld [vmem:[#allocation2 + $0x18] sm:$0xff]  ;;  %p165_p1 = scmp.ne.s32.totalorder %s86_s2, %s164_s28  ;;  %p170_p3 = scmp.lt.s32.totalorder %s164_s28, %s164_s28 }
  0x29   :  { %v72_v11 = vadd.f32 %v68_v2, %v64_v3  ;;  %v63_v14 = vld [vmem:[#allocation5 + $0x18] sm:$0xff]  ;;  %v73_v16 = vadd.f32 %v69_v6, %v65_v7 }
  0x2a   :  { %v71_v15 = vld [vmem:[#allocation7 + $0x18] sm:$0xff]  ;;  %v67_v17 = vadd.f32 %v63_v14, %v59_v13  ;;  %v74_v18 = vadd.f32 %v70_v10, %v66_v12  ;;  %p171_p4 = por %p170_p3, %p169_p2 }
  0x2b   :  { %76 = vst [vmem:[#allocation8] sm:$0xff] %v72_v11  ;;  %77 = vst [vmem:[#allocation8 + $0x8] sm:$0xff] %v73_v16 }
  0x2c   :  { %v75_v19 = vadd.f32 %v71_v15, %v67_v17  ;;  %78 = vst [vmem:[#allocation8 + $0x10] sm:$0xff] %v74_v18  ;;  %p172_p5 = pnand %p171_p4, %p165_p1 }
  0x2e   :  { %79 = vst [vmem:[#allocation8 + $0x18] sm:$0xff] %v75_v19 }
  0x2f   :  { %175 = shalt.err (!%p172_p5)
}
  0x30   :  { %91 = dma.vmem_to_hbm [thread:$0]  %s86_s2, 512, %s243_s3, [#allocation4], %s192_s17, %s192_s17, %s193_s18  }
  0x31   :  { %188 = dma.done.wait [#allocation4], 512  }
  0x32   :  { %189 = vsyncadd [#allocation4], 4294966784 }
  0x33   :  { %95 = vsyncpa [#allocation3], 1 }
  0x34   :  { %96 = vsyncpa [#allocation6], 1 }
  0x35   :  { %97 = vsyncpa [#allocation4], 1 }

</bundles_post_ra>
